<compile_context>
chip_gen: v5e
topology: v5e:2x2
jax: 0.10.0
libtpu: 0.0.40
codegen_flags: <defaults>
</compile_context>

<pallas_src>
import jax
import jax.numpy as jnp
from jax.experimental import pallas as pl
from jax.experimental.pallas import tpu as pltpu

EPS = 1e-5


def _pick_tile(dim, target):
    """Largest divisor of `dim` that is <= target and a multiple of 8 (or dim itself)."""
    t = min(dim, target)
    for cand in range(t, 0, -1):
        if dim % cand == 0 and (cand % 8 == 0 or cand == dim):
            return cand
    return dim


# --------------- Fused (LN1 + multi-head self-attention + residual) ---------------
def _attn_kernel(xq_ref, xkv_ref, g_ref, beta_ref,
                 wq_ref, bq_ref, wk_ref, bk_ref, wv_ref, bv_ref,
                 wo_ref, bo_ref, o_ref, k_sc, v_sc):
    # xq_ref : (TQ, E)  query-row tile of this batch's (T, E) slab (also the residual)
    # xkv_ref: (T,  E)  full sequence for this batch (keys/values)
    # k_sc/v_sc: (H, T, dh) bf16 VMEM scratch holding projected K/V for the current batch
    qi = pl.program_id(1)
    g = g_ref[...]
    beta = beta_ref[...]

    def ln(v):  # row-wise LayerNorm in f32
        m = jnp.mean(v, axis=-1, keepdims=True)
        c = v - m
        var = jnp.mean(c * c, axis=-1, keepdims=True)
        return c * jax.lax.rsqrt(var + EPS) * g + beta

    H, E, dh = wq_ref.shape

    # ---- K/V path: only on the first q-tile of each batch; cached in VMEM scratch. ----
    @pl.when(qi == 0)
    def _():
        xkv = xkv_ref[...].astype(jnp.float32)
        T = xkv.shape[0]
        xkv_n = ln(xkv).astype(jnp.bfloat16)
        xkv_b = jnp.broadcast_to(xkv_n.reshape(1, T, E), (H, T, E))
        k = jnp.einsum('hse,hed->hsd', xkv_b, wk_ref[...],
                       preferred_element_type=jnp.float32) + bk_ref[...]
        v = jnp.einsum('hse,hed->hsd', xkv_b, wv_ref[...],
                       preferred_element_type=jnp.float32) + bv_ref[...]
        k_sc[...] = k.astype(jnp.bfloat16)
        v_sc[...] = v.astype(jnp.bfloat16)

    # ---- Q path + attention for this query-row tile. ----
    xq = xq_ref[...].astype(jnp.float32)
    TQ = xq.shape[0]
    xq_n = ln(xq).astype(jnp.bfloat16)
    xq_b = jnp.broadcast_to(xq_n.reshape(1, TQ, E), (H, TQ, E))

    # q-scale is already folded into wq/bq by the wrapper.
    q = jnp.einsum('hte,hed->htd', xq_b, wq_ref[...],
                   preferred_element_type=jnp.float32) + bq_ref[...]

    s = jnp.einsum('htd,hsd->hts', q.astype(jnp.bfloat16), k_sc[...],
                   preferred_element_type=jnp.float32)          # (H, TQ, T)
    m = jnp.max(s, axis=-1, keepdims=True)
    p = jnp.exp(s - m)
    denom = jnp.sum(p, axis=-1, keepdims=True)
    p = p * pl.reciprocal(denom, approx=True)                   # EUP, not VPU divide

    ctx = jnp.einsum('hts,hsd->htd', p.astype(jnp.bfloat16), v_sc[...],
                     preferred_element_type=jnp.float32)        # (H, TQ, dh)
    out = jnp.einsum('htd,hde->hte', ctx.astype(jnp.bfloat16), wo_ref[...],
                     preferred_element_type=jnp.float32)        # (H, TQ, E)
    out = jnp.sum(out, axis=0) + bo_ref[...]                    # sum over heads

    o_ref[...] = (xq + out).astype(o_ref.dtype)                 # residual add


def attention_block(x_cols, params, num_heads, T, B, E):
    """x_cols: (T, B*E) seq-first view of the activation. Returns same shape."""
    H = num_heads
    dh = E // H
    scale = dh ** -0.5

    # Fold q-scale into Wq/bq; reshape weights per-head; bf16 for MXU operands.
    wq = (params["wq"] * scale).reshape(E, H, dh).transpose(1, 0, 2).astype(jnp.bfloat16)
    wk = params["wk"].reshape(E, H, dh).transpose(1, 0, 2).astype(jnp.bfloat16)
    wv = params["wv"].reshape(E, H, dh).transpose(1, 0, 2).astype(jnp.bfloat16)
    wo = params["wo"].reshape(H, dh, E).astype(jnp.bfloat16)
    bq = (params["bq"] * scale).reshape(1, H, dh).transpose(1, 0, 2)   # (H,1,dh) f32
    bk = params["bk"].reshape(1, H, dh).transpose(1, 0, 2)
    bv = params["bv"].reshape(1, H, dh).transpose(1, 0, 2)
    bo = params["bo"]                                                  # (1,E) f32

    TQ = _pick_tile(T, 128)
    NQ = T // TQ

    inv3 = lambda b, qi: (0, 0, 0)
    inv2 = lambda b, qi: (0, 0)

    return pl.pallas_call(
        _attn_kernel,
        out_shape=jax.ShapeDtypeStruct((T, B * E), x_cols.dtype),
        grid=(B, NQ),
        in_specs=[
            pl.BlockSpec((TQ, E), lambda b, qi: (qi, b)),   # q-row tile of batch b
            pl.BlockSpec((T, E), lambda b, qi: (0, b)),     # full seq of batch b (K/V)
            pl.BlockSpec((1, E), inv2),                     # ln1 gamma
            pl.BlockSpec((1, E), inv2),                     # ln1 beta
            pl.BlockSpec((H, E, dh), inv3), pl.BlockSpec((H, 1, dh), inv3),   # wq, bq
            pl.BlockSpec((H, E, dh), inv3), pl.BlockSpec((H, 1, dh), inv3),   # wk, bk
            pl.BlockSpec((H, E, dh), inv3), pl.BlockSpec((H, 1, dh), inv3),   # wv, bv
            pl.BlockSpec((H, dh, E), inv3), pl.BlockSpec((1, E), inv2),       # wo, bo
        ],
        out_specs=pl.BlockSpec((TQ, E), lambda b, qi: (qi, b)),
        scratch_shapes=[pltpu.VMEM((H, T, dh), jnp.bfloat16),   # cached K
                        pltpu.VMEM((H, T, dh), jnp.bfloat16)],  # cached V
        compiler_params=pltpu.CompilerParams(
            dimension_semantics=("parallel", "arbitrary")),
    )(x_cols, x_cols, params["ln1_g"], params["ln1_b"],
      wq, bq, wk, bk, wv, bv, wo, bo)


# -------------------- Fused (LN2 + FC1 + ReLU + FC2 + residual) --------------------
def _ffn_kernel(x_ref, g_ref, beta_ref, w1_ref, b1_ref, w2_ref, b2_ref, o_ref):
    x = x_ref[...].astype(jnp.float32)                       # (TR, E), also the residual
    m = jnp.mean(x, axis=-1, keepdims=True)
    c = x - m
    var = jnp.mean(c * c, axis=-1, keepdims=True)
    xn = (c * jax.lax.rsqrt(var + EPS) * g_ref[...] + beta_ref[...]).astype(jnp.bfloat16)

    h = jnp.dot(xn, w1_ref[...], preferred_element_type=jnp.float32) + b1_ref[...]
    h = jnp.maximum(h, 0.0).astype(jnp.bfloat16)
    y = jnp.dot(h, w2_ref[...], preferred_element_type=jnp.float32) + b2_ref[...]

    o_ref[...] = (x + y).astype(o_ref.dtype)


def ffn_block(x_rows, params):
    """x_rows: (N, E) flattened activation rows. Returns same shape."""
    N, E = x_rows.shape
    F = params["w1"].shape[1]
    TR = _pick_tile(N, 512)
    NR = N // TR

    w1 = params["w1"].astype(jnp.bfloat16)
    w2 = params["w2"].astype(jnp.bfloat16)
    inv = lambda r: (0, 0)

    return pl.pallas_call(
        _ffn_kernel,
        out_shape=jax.ShapeDtypeStruct((N, E), x_rows.dtype),
        grid=(NR,),
        in_specs=[
            pl.BlockSpec((TR, E), lambda r: (r, 0)),   # activation row tile
            pl.BlockSpec((1, E), inv),                 # ln2 gamma
            pl.BlockSpec((1, E), inv),                 # ln2 beta
            pl.BlockSpec((E, F), inv), pl.BlockSpec((1, F), inv),   # w1, b1
            pl.BlockSpec((F, E), inv), pl.BlockSpec((1, E), inv),   # w2, b2
        ],
        out_specs=pl.BlockSpec((TR, E), lambda r: (r, 0)),
        compiler_params=pltpu.CompilerParams(dimension_semantics=("parallel",)),
    )(x_rows, params["ln2_g"], params["ln2_b"], w1, params["b1"], w2, params["b2"])


# --------------------------------- Layer forward ------------------------------------
def decoder_layer_forward(x_tbe, params, num_heads, normalize_before=True):
    if not normalize_before:
        # TODO(synk): post-norm (normalize_before=False) path not implemented.
        raise NotImplementedError("only pre-norm (normalize_before=True) is implemented")
    T, B, E = x_tbe.shape

    # Seq-first view (T, B*E): free bitcast, lets BlockSpec pick per-batch (T,E) slabs
    # without any HBM transpose.  Requires E % 128 == 0 for lane-aligned blocks.
    x_cols = x_tbe.reshape(T, B * E)
    x_cols = attention_block(x_cols, params, num_heads, T, B, E)   # LN1+MHA+residual

    x_rows = x_cols.reshape(T * B, E)                              # free bitcast
    x_rows = ffn_block(x_rows, params)                             # LN2+FFN+residual

    # need_weights=False in the reference forward -> attn is None
    return x_rows.reshape(T, B, E), None, None


# ------------------------------- Pure-JAX reference ---------------------------------
def reference_forward(x_tbe, params, num_heads, normalize_before=True):
    def ln(x, g, b):
        m = jnp.mean(x, axis=-1, keepdims=True)
        v = jnp.mean((x - m) ** 2, axis=-1, keepdims=True)
        return (x - m) * jax.lax.rsqrt(v + EPS) * g[0] + b[0]

    T, B, E = x_tbe.shape
    dh = E // num_heads
    residual = x_tbe
    x = ln(x_tbe, params["ln1_g"], params["ln1_b"]) if normalize_before else x_tbe
    q = (x @ params["wq"] + params["bq"][0]) * dh ** -0.5
    k = x @ params["wk"] + params["bk"][0]
    v = x @ params["wv"] + params["bv"][0]
    q = q.reshape(T, B, num_heads, dh).transpose(1, 2, 0, 3)  # (B,H,T,dh)
    k = k.reshape(T, B, num_heads, dh).transpose(1, 2, 0, 3)
    v = v.reshape(T, B, num_heads, dh).transpose(1, 2, 0, 3)
    s = jnp.einsum("bhtd,bhsd->bhts", q, k)
    p = jax.nn.softmax(s, axis=-1)
    ctx = jnp.einsum("bhts,bhsd->bhtd", p, v).transpose(2, 0, 1, 3).reshape(T, B, E)
    x = ctx @ params["wo"] + params["bo"][0]
    x = residual + x
    if not normalize_before:
        x = ln(x, params["ln1_g"], params["ln1_b"])
    residual = x
    xn = ln(x, params["ln2_g"], params["ln2_b"]) if normalize_before else x
    h = jnp.maximum(xn @ params["w1"] + params["b1"][0], 0.0)
    y = h @ params["w2"] + params["b2"][0]
    x = residual + y
    if not normalize_before:
        x = ln(x, params["ln2_g"], params["ln2_b"])
    return x


# -------------------------------------- main ----------------------------------------
if __name__ == "__main__":
    # seq, batch, embed_dim, heads, ffn_embed_dim (E a multiple of 128 for lane-dense tiles)
    T, B, E, H, F = 8, 2, 128, 4, 256
    key = jax.random.PRNGKey(0)
    ks = jax.random.split(key, 8)

    def init_w(k, shape, scale=0.05):
        return (scale * jax.random.normal(k, shape)).astype(jnp.float32)

    params = {
        # attention projections stored as (in, out) so kernels compute x @ W
        "wq": init_w(ks[0], (E, E)), "bq": jnp.zeros((1, E), jnp.float32),
        "wk": init_w(ks[1], (E, E)), "bk": jnp.zeros((1, E), jnp.float32),
        "wv": init_w(ks[2], (E, E)), "bv": jnp.zeros((1, E), jnp.float32),
        "wo": init_w(ks[3], (E, E)), "bo": jnp.zeros((1, E), jnp.float32),
        # FFN
        "w1": init_w(ks[4], (E, F)), "b1": jnp.full((1, F), 0.01, jnp.float32),
        "w2": init_w(ks[5], (F, E)), "b2": jnp.full((1, E), 0.01, jnp.float32),
        # LayerNorms (torch default init)
        "ln1_g": jnp.ones((1, E), jnp.float32), "ln1_b": jnp.zeros((1, E), jnp.float32),
        "ln2_g": jnp.ones((1, E), jnp.float32), "ln2_b": jnp.zeros((1, E), jnp.float32),
    }

    x = jax.random.normal(ks[6], (T, B, E), dtype=jnp.float32)

    out, attn, _ = decoder_layer_forward(x, params, num_heads=H, normalize_before=True)
    out = jax.block_until_ready(out)

    ref = reference_forward(x, params, num_heads=H, normalize_before=True)
    assert out.shape == (T, B, E)
    assert attn is None
    # bf16 MXU operands + approx reciprocal -> slightly looser tolerance vs f32 reference
    assert jnp.allclose(out, ref, atol=3e-2, rtol=3e-2), "mismatch vs pure-JAX reference"

    print("KERNEL_OK")
</pallas_src>

<mosaic_0001>
module attributes {stable_mosaic.version = 11 : i64} {
  func.func @_attn_kernel(%arg0: i32, %arg1: i32, %arg2: memref<8x128xf32, #tpu.memory_space<vmem>>, %arg3: memref<8x128xf32, #tpu.memory_space<vmem>>, %arg4: memref<1x128xf32, #tpu.memory_space<vmem>>, %arg5: memref<1x128xf32, #tpu.memory_space<vmem>>, %arg6: memref<4x128x32xbf16, #tpu.memory_space<vmem>>, %arg7: memref<4x1x32xf32, #tpu.memory_space<vmem>>, %arg8: memref<4x128x32xbf16, #tpu.memory_space<vmem>>, %arg9: memref<4x1x32xf32, #tpu.memory_space<vmem>>, %arg10: memref<4x128x32xbf16, #tpu.memory_space<vmem>>, %arg11: memref<4x1x32xf32, #tpu.memory_space<vmem>>, %arg12: memref<4x32x128xbf16, #tpu.memory_space<vmem>>, %arg13: memref<1x128xf32, #tpu.memory_space<vmem>>, %arg14: memref<8x128xf32, #tpu.memory_space<vmem>>, %arg15: memref<4x8x32xbf16, #tpu.memory_space<vmem>>, %arg16: memref<4x8x32xbf16, #tpu.memory_space<vmem>>) attributes {dimension_semantics = [#tpu.dimension_semantics<parallel>, #tpu.dimension_semantics<arbitrary>], iteration_bounds = array<i64: 2, 1>, scalar_prefetch = 0 : i64, scratch_operands = 2 : i64, tpu.core_type = #tpu.core_type<tc>, window_params = [{transform_indices = @transform_0, window_bounds = array<i64: 8, 128>}, {transform_indices = @transform_1, window_bounds = array<i64: 8, 128>}, {pipeline_mode = #tpu.pipeline_mode<synchronous>, transform_indices = @transform_2, window_bounds = array<i64: 1, 128>}, {pipeline_mode = #tpu.pipeline_mode<synchronous>, transform_indices = @transform_3, window_bounds = array<i64: 1, 128>}, {pipeline_mode = #tpu.pipeline_mode<synchronous>, transform_indices = @transform_4, window_bounds = array<i64: 4, 128, 32>}, {pipeline_mode = #tpu.pipeline_mode<synchronous>, transform_indices = @transform_5, window_bounds = array<i64: 4, 1, 32>}, {pipeline_mode = #tpu.pipeline_mode<synchronous>, transform_indices = @transform_6, window_bounds = array<i64: 4, 128, 32>}, {pipeline_mode = #tpu.pipeline_mode<synchronous>, transform_indices = @transform_7, window_bounds = array<i64: 4, 1, 32>}, {pipeline_mode = #tpu.pipeline_mode<synchronous>, transform_indices = @transform_8, window_bounds = array<i64: 4, 128, 32>}, {pipeline_mode = #tpu.pipeline_mode<synchronous>, transform_indices = @transform_9, window_bounds = array<i64: 4, 1, 32>}, {pipeline_mode = #tpu.pipeline_mode<synchronous>, transform_indices = @transform_10, window_bounds = array<i64: 4, 32, 128>}, {pipeline_mode = #tpu.pipeline_mode<synchronous>, transform_indices = @transform_11, window_bounds = array<i64: 1, 128>}, {transform_indices = @transform_12, window_bounds = array<i64: 8, 128>}]} {
    %c0 = arith.constant 0 : index
    %c0_0 = arith.constant 0 : index
    %0 = vector.load %arg4[%c0, %c0_0] : memref<1x128xf32, #tpu.memory_space<vmem>>, vector<1x128xf32>
    %c0_1 = arith.constant 0 : index
    %c0_2 = arith.constant 0 : index
    %1 = vector.load %arg5[%c0_1, %c0_2] : memref<1x128xf32, #tpu.memory_space<vmem>>, vector<1x128xf32>
    %c0_i32 = arith.constant 0 : i32
    %2 = arith.cmpi eq, %arg1, %c0_i32 : i32
    %3 = arith.extui %2 : i1 to i32
    %c0_i32_3 = arith.constant 0 : i32
    %4 = arith.cmpi ne, %3, %c0_i32_3 : i32
    scf.if %4 {
      %c0_36 = arith.constant 0 : index
      %c0_37 = arith.constant 0 : index
      %60 = vector.load %arg3[%c0_36, %c0_37] : memref<8x128xf32, #tpu.memory_space<vmem>>, vector<8x128xf32>
      %cst_38 = arith.constant dense<0.000000e+00> : vector<8xf32>
      %61 = vector.multi_reduction <add>, %60, %cst_38 [1] : vector<8x128xf32> to vector<8xf32>
      %62 = vector.shape_cast %61 : vector<8xf32> to vector<8x1xf32>
      %cst_39 = arith.constant 1.280000e+02 : f32
      %63 = vector.broadcast %cst_39 : f32 to vector<8x1xf32>
      %64 = arith.divf %62, %63 : vector<8x1xf32>
      %65 = vector.broadcast %64 : vector<8x1xf32> to vector<8x128xf32>
      %66 = arith.subf %60, %65 : vector<8x128xf32>
      %67 = arith.mulf %66, %66 : vector<8x128xf32>
      %cst_40 = arith.constant dense<0.000000e+00> : vector<8xf32>
      %68 = vector.multi_reduction <add>, %67, %cst_40 [1] : vector<8x128xf32> to vector<8xf32>
      %69 = vector.shape_cast %68 : vector<8xf32> to vector<8x1xf32>
      %cst_41 = arith.constant 1.280000e+02 : f32
      %70 = vector.broadcast %cst_41 : f32 to vector<8x1xf32>
      %71 = arith.divf %69, %70 : vector<8x1xf32>
      %cst_42 = arith.constant 9.99999974E-6 : f32
      %72 = vector.broadcast %cst_42 : f32 to vector<8x1xf32>
      %73 = arith.addf %71, %72 : vector<8x1xf32>
      %74 = math.rsqrt %73 : vector<8x1xf32>
      %75 = vector.broadcast %74 : vector<8x1xf32> to vector<8x128xf32>
      %76 = arith.mulf %66, %75 : vector<8x128xf32>
      %77 = vector.broadcast %0 : vector<1x128xf32> to vector<8x128xf32>
      %78 = arith.mulf %76, %77 : vector<8x128xf32>
      %79 = vector.broadcast %1 : vector<1x128xf32> to vector<8x128xf32>
      %80 = arith.addf %78, %79 : vector<8x128xf32>
      %81 = arith.truncf %80 : vector<8x128xf32> to vector<8x128xbf16>
      %82 = vector.shape_cast %81 : vector<8x128xbf16> to vector<1x8x128xbf16>
      %83 = vector.shape_cast %82 : vector<1x8x128xbf16> to vector<1x8x128xbf16>
      %84 = vector.broadcast %83 : vector<1x8x128xbf16> to vector<4x8x128xbf16>
      %c0_43 = arith.constant 0 : index
      %c0_44 = arith.constant 0 : index
      %c0_45 = arith.constant 0 : index
      %85 = vector.load %arg8[%c0_43, %c0_44, %c0_45] : memref<4x128x32xbf16, #tpu.memory_space<vmem>>, vector<4x128x32xbf16>
      "tpu.trace_start"() <{level = 10 : i32, message = "hse,hed->hsd"}> : () -> ()
      %cst_46 = arith.constant dense<0.000000e+00> : vector<4x8x32xf32>
      %86 = tpu.matmul %84, %85, %cst_46 {dimension_numbers = #tpu.dot_dimension_numbers<[2], [1], [1], [2], [0, 0, 0, 1, 1, 2], [0], [0]>} : vector<4x8x128xbf16>, vector<4x128x32xbf16>, vector<4x8x32xf32> -> vector<4x8x32xf32>
      "tpu.trace_stop"() : () -> ()
      %c0_47 = arith.constant 0 : index
      %c0_48 = arith.constant 0 : index
      %c0_49 = arith.constant 0 : index
      %87 = vector.load %arg9[%c0_47, %c0_48, %c0_49] : memref<4x1x32xf32, #tpu.memory_space<vmem>>, vector<4x1x32xf32>
      %88 = vector.broadcast %87 : vector<4x1x32xf32> to vector<4x8x32xf32>
      %89 = arith.addf %86, %88 : vector<4x8x32xf32>
      %c0_50 = arith.constant 0 : index
      %c0_51 = arith.constant 0 : index
      %c0_52 = arith.constant 0 : index
      %90 = vector.load %arg10[%c0_50, %c0_51, %c0_52] : memref<4x128x32xbf16, #tpu.memory_space<vmem>>, vector<4x128x32xbf16>
      "tpu.trace_start"() <{level = 10 : i32, message = "hse,hed->hsd"}> : () -> ()
      %cst_53 = arith.constant dense<0.000000e+00> : vector<4x8x32xf32>
      %91 = tpu.matmul %84, %90, %cst_53 {dimension_numbers = #tpu.dot_dimension_numbers<[2], [1], [1], [2], [0, 0, 0, 1, 1, 2], [0], [0]>} : vector<4x8x128xbf16>, vector<4x128x32xbf16>, vector<4x8x32xf32> -> vector<4x8x32xf32>
      "tpu.trace_stop"() : () -> ()
      %c0_54 = arith.constant 0 : index
      %c0_55 = arith.constant 0 : index
      %c0_56 = arith.constant 0 : index
      %92 = vector.load %arg11[%c0_54, %c0_55, %c0_56] : memref<4x1x32xf32, #tpu.memory_space<vmem>>, vector<4x1x32xf32>
      %93 = vector.broadcast %92 : vector<4x1x32xf32> to vector<4x8x32xf32>
      %94 = arith.addf %91, %93 : vector<4x8x32xf32>
      %95 = arith.truncf %89 : vector<4x8x32xf32> to vector<4x8x32xbf16>
      %c0_57 = arith.constant 0 : index
      %c0_58 = arith.constant 0 : index
      %c0_59 = arith.constant 0 : index
      %96 = vector.load %arg15[%c0_57, %c0_58, %c0_59] : memref<4x8x32xbf16, #tpu.memory_space<vmem>>, vector<4x8x32xbf16>
      tpu.vector_store %arg15[%c0_57, %c0_58, %c0_59], %95 {strides = array<i32>} : memref<4x8x32xbf16, #tpu.memory_space<vmem>>, vector<4x8x32xbf16>,
      %97 = arith.truncf %94 : vector<4x8x32xf32> to vector<4x8x32xbf16>
      %c0_60 = arith.constant 0 : index
      %c0_61 = arith.constant 0 : index
      %c0_62 = arith.constant 0 : index
      %98 = vector.load %arg16[%c0_60, %c0_61, %c0_62] : memref<4x8x32xbf16, #tpu.memory_space<vmem>>, vector<4x8x32xbf16>
      tpu.vector_store %arg16[%c0_60, %c0_61, %c0_62], %97 {strides = array<i32>} : memref<4x8x32xbf16, #tpu.memory_space<vmem>>, vector<4x8x32xbf16>,
    } else {
    }
    %c0_4 = arith.constant 0 : index
    %c0_5 = arith.constant 0 : index
    %5 = vector.load %arg2[%c0_4, %c0_5] : memref<8x128xf32, #tpu.memory_space<vmem>>, vector<8x128xf32>
    %cst = arith.constant dense<0.000000e+00> : vector<8xf32>
    %6 = vector.multi_reduction <add>, %5, %cst [1] : vector<8x128xf32> to vector<8xf32>
    %7 = vector.shape_cast %6 : vector<8xf32> to vector<8x1xf32>
    %cst_6 = arith.constant 1.280000e+02 : f32
    %8 = vector.broadcast %cst_6 : f32 to vector<8x1xf32>
    %9 = arith.divf %7, %8 : vector<8x1xf32>
    %10 = vector.broadcast %9 : vector<8x1xf32> to vector<8x128xf32>
    %11 = arith.subf %5, %10 : vector<8x128xf32>
    %12 = arith.mulf %11, %11 : vector<8x128xf32>
    %cst_7 = arith.constant dense<0.000000e+00> : vector<8xf32>
    %13 = vector.multi_reduction <add>, %12, %cst_7 [1] : vector<8x128xf32> to vector<8xf32>
    %14 = vector.shape_cast %13 : vector<8xf32> to vector<8x1xf32>
    %cst_8 = arith.constant 1.280000e+02 : f32
    %15 = vector.broadcast %cst_8 : f32 to vector<8x1xf32>
    %16 = arith.divf %14, %15 : vector<8x1xf32>
    %cst_9 = arith.constant 9.99999974E-6 : f32
    %17 = vector.broadcast %cst_9 : f32 to vector<8x1xf32>
    %18 = arith.addf %16, %17 : vector<8x1xf32>
    %19 = math.rsqrt %18 : vector<8x1xf32>
    %20 = vector.broadcast %19 : vector<8x1xf32> to vector<8x128xf32>
    %21 = arith.mulf %11, %20 : vector<8x128xf32>
    %22 = vector.broadcast %0 : vector<1x128xf32> to vector<8x128xf32>
    %23 = arith.mulf %21, %22 : vector<8x128xf32>
    %24 = vector.broadcast %1 : vector<1x128xf32> to vector<8x128xf32>
    %25 = arith.addf %23, %24 : vector<8x128xf32>
    %26 = arith.truncf %25 : vector<8x128xf32> to vector<8x128xbf16>
    %27 = vector.shape_cast %26 : vector<8x128xbf16> to vector<1x8x128xbf16>
    %28 = vector.shape_cast %27 : vector<1x8x128xbf16> to vector<1x8x128xbf16>
    %29 = vector.broadcast %28 : vector<1x8x128xbf16> to vector<4x8x128xbf16>
    %c0_10 = arith.constant 0 : index
    %c0_11 = arith.constant 0 : index
    %c0_12 = arith.constant 0 : index
    %30 = vector.load %arg6[%c0_10, %c0_11, %c0_12] : memref<4x128x32xbf16, #tpu.memory_space<vmem>>, vector<4x128x32xbf16>
    "tpu.trace_start"() <{level = 10 : i32, message = "hte,hed->htd"}> : () -> ()
    %cst_13 = arith.constant dense<0.000000e+00> : vector<4x8x32xf32>
    %31 = tpu.matmul %29, %30, %cst_13 {dimension_numbers = #tpu.dot_dimension_numbers<[2], [1], [1], [2], [0, 0, 0, 1, 1, 2], [0], [0]>} : vector<4x8x128xbf16>, vector<4x128x32xbf16>, vector<4x8x32xf32> -> vector<4x8x32xf32>
    "tpu.trace_stop"() : () -> ()
    %c0_14 = arith.constant 0 : index
    %c0_15 = arith.constant 0 : index
    %c0_16 = arith.constant 0 : index
    %32 = vector.load %arg7[%c0_14, %c0_15, %c0_16] : memref<4x1x32xf32, #tpu.memory_space<vmem>>, vector<4x1x32xf32>
    %33 = vector.broadcast %32 : vector<4x1x32xf32> to vector<4x8x32xf32>
    %34 = arith.addf %31, %33 : vector<4x8x32xf32>
    %35 = arith.truncf %34 : vector<4x8x32xf32> to vector<4x8x32xbf16>
    %c0_17 = arith.constant 0 : index
    %c0_18 = arith.constant 0 : index
    %c0_19 = arith.constant 0 : index
    %36 = vector.load %arg15[%c0_17, %c0_18, %c0_19] : memref<4x8x32xbf16, #tpu.memory_space<vmem>>, vector<4x8x32xbf16>
    "tpu.trace_start"() <{level = 10 : i32, message = "htd,hsd->hts"}> : () -> ()
    %cst_20 = arith.constant dense<0.000000e+00> : vector<4x8x8xf32>
    %37 = tpu.matmul %35, %36, %cst_20 {dimension_numbers = #tpu.dot_dimension_numbers<[2], [2], [1], [1], [0, 0, 0, 1, 1, 1], [0], [0]>} : vector<4x8x32xbf16>, vector<4x8x32xbf16>, vector<4x8x8xf32> -> vector<4x8x8xf32>
    "tpu.trace_stop"() : () -> ()
    %cst_21 = arith.constant dense<0xFF800000> : vector<4x8xf32>
    %38 = vector.multi_reduction <maximumf>, %37, %cst_21 [2] : vector<4x8x8xf32> to vector<4x8xf32>
    %39 = vector.shape_cast %38 : vector<4x8xf32> to vector<4x8x1xf32>
    %40 = vector.broadcast %39 : vector<4x8x1xf32> to vector<4x8x8xf32>
    %41 = arith.subf %37, %40 : vector<4x8x8xf32>
    %42 = math.exp %41 : vector<4x8x8xf32>
    %cst_22 = arith.constant dense<0.000000e+00> : vector<4x8xf32>
    %43 = vector.multi_reduction <add>, %42, %cst_22 [2] : vector<4x8x8xf32> to vector<4x8xf32>
    %44 = vector.shape_cast %43 : vector<4x8xf32> to vector<4x8x1xf32>
    %45 = tpu.reciprocal %44 {approx = true} : vector<4x8x1xf32> -> vector<4x8x1xf32>
    %46 = vector.broadcast %45 : vector<4x8x1xf32> to vector<4x8x8xf32>
    %47 = arith.mulf %42, %46 : vector<4x8x8xf32>
    %48 = arith.truncf %47 : vector<4x8x8xf32> to vector<4x8x8xbf16>
    %c0_23 = arith.constant 0 : index
    %c0_24 = arith.constant 0 : index
    %c0_25 = arith.constant 0 : index
    %49 = vector.load %arg16[%c0_23, %c0_24, %c0_25] : memref<4x8x32xbf16, #tpu.memory_space<vmem>>, vector<4x8x32xbf16>
    "tpu.trace_start"() <{level = 10 : i32, message = "hts,hsd->htd"}> : () -> ()
    %cst_26 = arith.constant dense<0.000000e+00> : vector<4x8x32xf32>
    %50 = tpu.matmul %48, %49, %cst_26 {dimension_numbers = #tpu.dot_dimension_numbers<[2], [1], [1], [2], [0, 0, 0, 1, 1, 2], [0], [0]>} : vector<4x8x8xbf16>, vector<4x8x32xbf16>, vector<4x8x32xf32> -> vector<4x8x32xf32>
    "tpu.trace_stop"() : () -> ()
    %51 = arith.truncf %50 : vector<4x8x32xf32> to vector<4x8x32xbf16>
    %c0_27 = arith.constant 0 : index
    %c0_28 = arith.constant 0 : index
    %c0_29 = arith.constant 0 : index
    %52 = vector.load %arg12[%c0_27, %c0_28, %c0_29] : memref<4x32x128xbf16, #tpu.memory_space<vmem>>, vector<4x32x128xbf16>
    "tpu.trace_start"() <{level = 10 : i32, message = "htd,hde->hte"}> : () -> ()
    %cst_30 = arith.constant dense<0.000000e+00> : vector<4x8x128xf32>
    %53 = tpu.matmul %51, %52, %cst_30 {dimension_numbers = #tpu.dot_dimension_numbers<[2], [1], [1], [2], [0, 0, 0, 1, 1, 2], [0], [0]>} : vector<4x8x32xbf16>, vector<4x32x128xbf16>, vector<4x8x128xf32> -> vector<4x8x128xf32>
    "tpu.trace_stop"() : () -> ()
    %cst_31 = arith.constant dense<0.000000e+00> : vector<8x128xf32>
    %54 = vector.multi_reduction <add>, %53, %cst_31 [0] : vector<4x8x128xf32> to vector<8x128xf32>
    %c0_32 = arith.constant 0 : index
    %c0_33 = arith.constant 0 : index
    %55 = vector.load %arg13[%c0_32, %c0_33] : memref<1x128xf32, #tpu.memory_space<vmem>>, vector<1x128xf32>
    %56 = vector.broadcast %55 : vector<1x128xf32> to vector<8x128xf32>
    %57 = arith.addf %54, %56 : vector<8x128xf32>
    %58 = arith.addf %5, %57 : vector<8x128xf32>
    %c0_34 = arith.constant 0 : index
    %c0_35 = arith.constant 0 : index
    %59 = vector.load %arg14[%c0_34, %c0_35] : memref<8x128xf32, #tpu.memory_space<vmem>>, vector<8x128xf32>
    tpu.vector_store %arg14[%c0_34, %c0_35], %58 {strides = array<i32>} : memref<8x128xf32, #tpu.memory_space<vmem>>, vector<8x128xf32>,
    return
  }
  func.func @transform_0(%arg0: i32, %arg1: i32) -> (i32, i32) {
    %c0_i32 = arith.constant 0 : i32
    return %arg1, %arg0 : i32, i32
  }
  func.func @transform_1(%arg0: i32, %arg1: i32) -> (i32, i32) {
    %c0_i32 = arith.constant 0 : i32
    %c0_i32_0 = arith.constant 0 : i32
    return %c0_i32, %arg0 : i32, i32
  }
  func.func @transform_2(%arg0: i32, %arg1: i32) -> (i32, i32) {
    %c0_i32 = arith.constant 0 : i32
    %c0_i32_0 = arith.constant 0 : i32
    %c0_i32_1 = arith.constant 0 : i32
    return %c0_i32, %c0_i32_0 : i32, i32
  }
  func.func @transform_3(%arg0: i32, %arg1: i32) -> (i32, i32) {
    %c0_i32 = arith.constant 0 : i32
    %c0_i32_0 = arith.constant 0 : i32
    %c0_i32_1 = arith.constant 0 : i32
    return %c0_i32, %c0_i32_0 : i32, i32
  }
  func.func @transform_4(%arg0: i32, %arg1: i32) -> (i32, i32, i32) {
    %c0_i32 = arith.constant 0 : i32
    %c0_i32_0 = arith.constant 0 : i32
    %c0_i32_1 = arith.constant 0 : i32
    %c0_i32_2 = arith.constant 0 : i32
    return %c0_i32, %c0_i32_0, %c0_i32_1 : i32, i32, i32
  }
  func.func @transform_5(%arg0: i32, %arg1: i32) -> (i32, i32, i32) {
    %c0_i32 = arith.constant 0 : i32
    %c0_i32_0 = arith.constant 0 : i32
    %c0_i32_1 = arith.constant 0 : i32
    %c0_i32_2 = arith.constant 0 : i32
    return %c0_i32, %c0_i32_0, %c0_i32_1 : i32, i32, i32
  }
  func.func @transform_6(%arg0: i32, %arg1: i32) -> (i32, i32, i32) {
    %c0_i32 = arith.constant 0 : i32
    %c0_i32_0 = arith.constant 0 : i32
    %c0_i32_1 = arith.constant 0 : i32
    %c0_i32_2 = arith.constant 0 : i32
    return %c0_i32, %c0_i32_0, %c0_i32_1 : i32, i32, i32
  }
  func.func @transform_7(%arg0: i32, %arg1: i32) -> (i32, i32, i32) {
    %c0_i32 = arith.constant 0 : i32
    %c0_i32_0 = arith.constant 0 : i32
    %c0_i32_1 = arith.constant 0 : i32
    %c0_i32_2 = arith.constant 0 : i32
    return %c0_i32, %c0_i32_0, %c0_i32_1 : i32, i32, i32
  }
  func.func @transform_8(%arg0: i32, %arg1: i32) -> (i32, i32, i32) {
    %c0_i32 = arith.constant 0 : i32
    %c0_i32_0 = arith.constant 0 : i32
    %c0_i32_1 = arith.constant 0 : i32
    %c0_i32_2 = arith.constant 0 : i32
    return %c0_i32, %c0_i32_0, %c0_i32_1 : i32, i32, i32
  }
  func.func @transform_9(%arg0: i32, %arg1: i32) -> (i32, i32, i32) {
    %c0_i32 = arith.constant 0 : i32
    %c0_i32_0 = arith.constant 0 : i32
    %c0_i32_1 = arith.constant 0 : i32
    %c0_i32_2 = arith.constant 0 : i32
    return %c0_i32, %c0_i32_0, %c0_i32_1 : i32, i32, i32
  }
  func.func @transform_10(%arg0: i32, %arg1: i32) -> (i32, i32, i32) {
    %c0_i32 = arith.constant 0 : i32
    %c0_i32_0 = arith.constant 0 : i32
    %c0_i32_1 = arith.constant 0 : i32
    %c0_i32_2 = arith.constant 0 : i32
    return %c0_i32, %c0_i32_0, %c0_i32_1 : i32, i32, i32
  }
  func.func @transform_11(%arg0: i32, %arg1: i32) -> (i32, i32) {
    %c0_i32 = arith.constant 0 : i32
    %c0_i32_0 = arith.constant 0 : i32
    %c0_i32_1 = arith.constant 0 : i32
    return %c0_i32, %c0_i32_0 : i32, i32
  }
  func.func @transform_12(%arg0: i32, %arg1: i32) -> (i32, i32) {
    %c0_i32 = arith.constant 0 : i32
    return %arg1, %arg0 : i32, i32
  }
}

</mosaic_0001>

<bundles_post_ra>
// kernel: tpu_custom_call.1
= control target key start
LH: loop header
LB: loop body
LE: loop exit
PB: predicated region body
PF: predicated region fallthrough
CT: control target
= control target key end

     0   :  { %s3297_s0 = inlined_call_operand.vmem [shape: f32[8,256], index: 0, kind: input, shape index: {}]   ;;  %s3298_s1 = inlined_call_operand.vmem [shape: f32[8,256], index: 1, kind: input, shape index: {}]   ;;  %s3299_s2 = inlined_call_operand.vmem [shape: f32[1,128], index: 2, kind: input, shape index: {}]   ;;  %s3300_s3 = inlined_call_operand.vmem [shape: f32[1,128], index: 3, kind: input, shape index: {}]   ;;  %s3301_s4 = inlined_call_operand.vmem [shape: bf16[4,128,32], index: 4, kind: input, shape index: {}]   ;;  %s3302_s5 = inlined_call_operand.vmem [shape: f32[4,1,32], index: 5, kind: input, shape index: {}]   ;;  %s3303_s6 = inlined_call_operand.vmem [shape: bf16[4,128,32], index: 6, kind: input, shape index: {}]   ;;  %s3304_s7 = inlined_call_operand.vmem [shape: f32[4,1,32], index: 7, kind: input, shape index: {}]   ;;  %s3305_s8 = inlined_call_operand.vmem [shape: bf16[4,128,32], index: 8, kind: input, shape index: {}]   ;;  %s3306_s9 = inlined_call_operand.vmem [shape: f32[4,1,32], index: 9, kind: input, shape index: {}]   ;;  %s3307_s10 = inlined_call_operand.vmem [shape: bf16[4,32,128], index: 10, kind: input, shape index: {}]   ;;  %s3308_s11 = inlined_call_operand.vmem [shape: f32[1,128], index: 11, kind: input, shape index: {}]   ;;  %s3309_s12 = inlined_call_operand.hbm [shape: f32[8,256], index: 12, kind: output, shape index: {}]  }
   0x1   :  { %3312 = sst [smem:[#allocation9_spill]] %s3297_s0 }
   0x2   :  { %3313 = sst [smem:[#allocation10_spill]] %s3298_s1 }
   0x3   :  { %17 = vsyncpa [#allocation5], 0 }
   0x4   :  { %19 = vsyncpa [#allocation5 + $0x1], 0  ;;  %s2769_s21 = smov 0   ;;  %s2771_s22 = smov 0  }
   0x5   :  { %s2773_s23 = smov 0   ;;  %s2775_s24 = smov 0  }
   0x6   :  { %s2777_s25 = smov 0   ;;  %s2779_s26 = smov 0  }
   0x7 LB: > { %3314 = sst [smem:[#allocation7_spill]] %s2697_s25  ;;  %s1986_s27 = sadd.s32 4294967295, %s2701_s26   ;;  %s2701_s26 = sphi %s2779_s26, %s25_s26   ;;  %s2697_s25 = sphi %s2777_s25, %s3323_s25   ;;  %s2693_s24 = sphi %s2775_s24, %s3322_s24   ;;  %s2689_s23 = sphi %s2773_s23, %s3326_s23   ;;  %s2685_s22 = sphi %s2771_s22, %s3325_s22   ;;  %s2681_s21 = sphi %s2769_s21, %s3324_s21  }
   0x8   : > { %s1987_s28 = sadd.s32 4294967294, %s2701_s26   ;;  %s37_s29 = sadd.s32 1, %s2697_s25 }
   0x9   : > { %s310_s30 = sadd.s32 1, %s2689_s23  ;;  %p39_p0 = scmp.ge.s32.totalorder %s37_s29, 2 }
   0xa   : > { %p320_p1 = scmp.ne.s32.totalorder %s2689_s23, %s2685_s22  ;;  %p321_p2 = scmp.eq.s32.totalorder %s1986_s27, 1 }
   0xb   : > { %p326_p3 = scmp.ne.s32.totalorder %s2685_s22, %s2681_s21  ;;  %s3328_s29 = smov (%p39_p0, %s37_s29), 0 }
   0xc   : > { %3315 = sst [smem:[#allocation8_spill]] %s3328_s29  ;;  %p2809_p4 = por %p321_p2, %p320_p1 }
   0xd   : > { %p327_p5 = scmp.eq.s32.totalorder %s1987_s28, 1  ;;  %s306_s14 = ssub.s32 %s2697_s25, %s3328_s29 }
   0xe   : > { %p1990_p6 = scmp.ge.s32.totalorder %s2701_s26, 1  ;;  %p308_p7 = scmp.eq.s32.totalorder %s306_s14, 0 }
   0xf   : > { %p2816_p8 = por %p327_p5, %p326_p3  ;;  %p393_p9 = scmp.lt.s32.totalorder %s2701_s26, 3 }
  0x10   : > { %s2822_s16 = scalar_select %p308_p7, %s2689_s23, %s310_s30  }
  0x11   : > { %p394_p10 = pnand %p1990_p6, %p393_p9 }
  0x12   : > { %p444_p11 = scmp.lt.s32.totalorder (!%p394_p10), %s2693_s24, 1  ;;  %s3318_s1 = sld [smem:[#allocation10_spill]] (!%p394_p10) }
  0x13   : > { %397 = sbr.rel (%p394_p10) target bundleno = 1140 (0x474), region = 68  ;;  %s3319_s0 = sld [smem:[#allocation9_spill]] (!%p394_p10) }
  0x14   : > { %s2423_s28 = sshll.u32 (!%p394_p10), %s2693_s24, 3 }
  0x15   : > { %s1894_s25 = scalar_lea.hbm (!%p394_p10), %s3309_s12, %s2423_s28 }
  0x16   : > { %s1898_s20 = sshll.u32 (!%p394_p10), %s1894_s25, 4  ;;  %s1899_s20 = int_to_ptr.hbm [resolvable:$true] %s1898_s20 }
  0x18   : > { %s445_s17 = scalar_select %p444_p11, %s2693_s24, 1  ;;  %v2703_v2 = vmov 128.0   ;;  %v2433_v5 = vld [vmem:[%s3303_s6 + $0x38] sm:$0xff]  ;;  %v2432_v9 = vld [vmem:[%s3303_s6 + $0x30] sm:$0xff]  ;;  %v2431_v14 = vld [vmem:[%s3303_s6 + $0x28] sm:$0xff]  ;;  %vm1150_vm7 = vcmask 257024  }
  0x19   : > { %2601 = vrcp.f32 %v2703_v2  ;;  %v2441_v6 = vld [vmem:[%s3303_s6 + $0x78] sm:$0xff]  ;;  %626 = vmatpush.bf16.msra.mxu0 %v2433_v5  ;;  %v2440_v10 = vld [vmem:[%s3303_s6 + $0x70] sm:$0xff]  ;;  %v2439_v15 = vld [vmem:[%s3303_s6 + $0x68] sm:$0xff]  ;;  %vm1532_vm8 = vcmask 261120   ;;  %vm1665_vm9 = vcmask 1043456   ;;  %vm1609_vm10 = vcmask 64512  }
  0x1a   : > { %s1992_s18 = sshll.u32 %s445_s17, 3  ;;  %v2449_v7 = vld [vmem:[%s3303_s6 + $0xb8] sm:$0xff]  ;;  %687 = vmatpush.bf16.msra.mxu1 %v2441_v6  ;;  %v2448_v12 = vld [vmem:[%s3303_s6 + $0xb0] sm:$0xff]  ;;  %v2447_v17 = vld [vmem:[%s3303_s6 + $0xa8] sm:$0xff] }
  0x1b   : > { %s453_s27 = scalar_lea.vmem %s3318_s1, %s1992_s18  ;;  %s449_s29 = scalar_lea.vmem %s3319_s0, %s1992_s18  ;;  %v2457_v8 = vld [vmem:[%s3303_s6 + $0xf8] sm:$0xff]  ;;  %748 = vmatpush.bf16.msra.mxu2 %v2449_v7  ;;  %v2456_v13 = vld [vmem:[%s3303_s6 + $0xf0] sm:$0xff]  ;;  %v2455_v18 = vld [vmem:[%s3303_s6 + $0xe8] sm:$0xff] }
  0x1c   : > { %v461_v0 = vld [vmem:[%s453_s27] sm:$0xff]  ;;  %809 = vmatpush.bf16.msra.mxu3 %v2457_v8  ;;  %v2429_v24 = vld [vmem:[%s3303_s6 + $0x18] sm:$0xff]  ;;  %v2428_v31 = vld [vmem:[%s3303_s6 + $0x10] sm:$0xff]  ;;  %s2637_s27 = sshra.s32 %s1899_s20, 4  ;;  %s2638_s27 = int_to_ptr.hbm [resolvable:$true] %s2637_s27 }
  0x1d   : > { %462 = vadd.xlane.f32.xlu0 %v461_v0  ;;  %v2832_v1 = vld [vmem:[%s449_s29] sm:$0xff]  ;;  %627 = vmatpush.bf16.msra.mxu0 %v2432_v9  ;;  %v2437_v25 = vld [vmem:[%s3303_s6 + $0x58] sm:$0xff]  ;;  %v2436_v32 = vld [vmem:[%s3303_s6 + $0x50] sm:$0xff]  ;;  %s439_s29 = sand.u32 1, %s2685_s22   ;;  %s2639_s14 = scalar_lea.hbm %s2638_s27, 8 }
  0x1e   : > { %688 = vmatpush.bf16.msra.mxu1 %v2440_v10  ;;  %v2430_v19 = vld [vmem:[%s3303_s6 + $0x20] sm:$0xff]  ;;  %v2445_v27 = vld [vmem:[%s3303_s6 + $0x98] sm:$0xff]  ;;  %v2444_v33 = vld [vmem:[%s3303_s6 + $0x90] sm:$0xff]  ;;  %s1991_s18 = sshll.u32 %s439_s29, 3  ;;  %s1882_s24 = scalar_lea.sflag [#allocation5], %s439_s29 }
  0x1f   : > { %v2602_v3 = vpop.eup %2601  ;;  %749 = vmatpush.bf16.msra.mxu2 %v2448_v12  ;;  %v2438_v20 = vld [vmem:[%s3303_s6 + $0x60] sm:$0xff]  ;;  %v2453_v28 = vld [vmem:[%s3303_s6 + $0xd8] sm:$0xff]  ;;  %v2452_v34 = vld [vmem:[%s3303_s6 + $0xd0] sm:$0xff]  ;;  %s441_s19 = scalar_lea.vmem [#allocation4], %s1991_s18  ;;  %p2640_p12 = scmp.ne.s32.totalorder %s2638_s27, %s2639_s14 }
  0x20   : > { %v465_v4 = vmul.f32 128.0, %v2602_v3  ;;  %810 = vmatpush.bf16.msra.mxu3 %v2456_v13  ;;  %v2446_v22 = vld [vmem:[%s3303_s6 + $0xa0] sm:$0xff]  ;;  %vm469_vm0 = vweird.f32 %v2602_v3  ;;  %v2427_v37 = vld [vmem:[%s3303_s6 + $0x8] sm:$0xff]  ;;  %v2465_v49 = vld [vmem:[%s3305_s8 + $0x38] sm:$0xff]  ;;  %s1896_s1 = sshll.u32 %s441_s19, 4  ;;  %s2643_s18 = scalar_lea.hbm %s3309_s12, 16  ;;  %s1897_s1 = int_to_ptr.vmem [resolvable:$true] %s1896_s1 }
  0x21   : > { %628 = vmatpush.bf16.msra.mxu0 %v2431_v14  ;;  %v2454_v23 = vld [vmem:[%s3303_s6 + $0xe0] sm:$0xff]  ;;  %v2435_v38 = vld [vmem:[%s3303_s6 + $0x48] sm:$0xff]  ;;  %v2473_v50 = vld [vmem:[%s3305_s8 + $0x78] sm:$0xff]  ;;  %p2641_p13 = pnand %p2640_p12, %p2809_p4  ;;  %p2644_p1 = scmp.lt.s32.totalorder %s2638_s27, %s3309_s12 }
  0x22   : > { %v466_v11 = vsub.f32 1.0, %v465_v4  ;;  %689 = vmatpush.bf16.msra.mxu1 %v2439_v15  ;;  %v2443_v39 = vld [vmem:[%s3303_s6 + $0x88] sm:$0xff]  ;;  %v2426_v45 = vld [vmem:[%s3303_s6] sm:$0xff]  ;;  %v2481_v51 = vld [vmem:[%s3305_s8 + $0xb8] sm:$0xff]  ;;  %p2645_p2 = scmp.lt.s32.totalorder %s2643_s18, %s2639_s14 }
  0x23   : > { %750 = vmatpush.bf16.msra.mxu2 %v2447_v17  ;;  %v2451_v40 = vld [vmem:[%s3303_s6 + $0xc8] sm:$0xff]  ;;  %v2434_v46 = vld [vmem:[%s3303_s6 + $0x40] sm:$0xff]  ;;  %v2489_v52 = vld [vmem:[%s3305_s8 + $0xf8] sm:$0xff]  ;;  %p2642_p0 = pneg %p2641_p13 }
  0x24   : > { %v467_v16 = vmul.f32 %v2602_v3, %v466_v11  ;;  %811 = vmatpush.bf16.msra.mxu3 %v2455_v18  ;;  %v2442_v47 = vld [vmem:[%s3303_s6 + $0x80] sm:$0xff]  ;;  %v2464_v53 = vld [vmem:[%s3305_s8 + $0x30] sm:$0xff]  ;;  %v2463_v57 = vld [vmem:[%s3305_s8 + $0x28] sm:$0xff]  ;;  %p2646_p3 = por %p2645_p2, %p2644_p1 }
  0x25   : > { %1164 = vadd.xlane.f32.xlu0 %v2832_v1  ;;  %629 = vmatpush.bf16.msra.mxu0 %v2430_v19  ;;  %v2450_v48 = vld [vmem:[%s3303_s6 + $0xc0] sm:$0xff]  ;;  %v2472_v54 = vld [vmem:[%s3305_s8 + $0x70] sm:$0xff]  ;;  %v2471_v58 = vld [vmem:[%s3305_s8 + $0x68] sm:$0xff] }
  0x26   : > { %v468_v21 = vadd.f32 %v2602_v3, %v467_v16  ;;  %690 = vmatpush.bf16.msra.mxu1 %v2438_v20  ;;  %v2480_v55 = vld [vmem:[%s3305_s8 + $0xb0] sm:$0xff]  ;;  %v2479_v59 = vld [vmem:[%s3305_s8 + $0xa8] sm:$0xff]  ;;  %v2462_v61 = vld [vmem:[%s3305_s8 + $0x20] sm:$0xff]  ;;  %p2647_p5 = pnand %p2646_p3, %p2642_p0 }
  0x27   : > { %751 = vmatpush.bf16.msra.mxu2 %v2446_v22  ;;  %v2488_v56 = vld [vmem:[%s3305_s8 + $0xf0] sm:$0xff]  ;;  %v2487_v60 = vld [vmem:[%s3305_s8 + $0xe8] sm:$0xff]  ;;  %v2470_v62 = vld [vmem:[%s3305_s8 + $0x60] sm:$0xff] }
  0x28   : > { %v2889_v26 = vsel %vm469_vm0, %v2602_v3, %v468_v21  ;;  %812 = vmatpush.bf16.msra.mxu3 %v2454_v23  ;;  %v2478_v63 = vld [vmem:[%s3305_s8 + $0xa0] sm:$0xff]  ;;  %v2461_v2 = vld [vmem:[%s3305_s8 + $0x18] sm:$0xff]  ;;  %v2460_v6 = vld [vmem:[%s3305_s8 + $0x10] sm:$0xff] }
  0x29   : > { %630 = vmatpush.bf16.msra.mxu0 %v2429_v24  ;;  %v2469_v3 = vld [vmem:[%s3305_s8 + $0x58] sm:$0xff]  ;;  %v2468_v7 = vld [vmem:[%s3305_s8 + $0x50] sm:$0xff]  ;;  %v2459_v10 = vld [vmem:[%s3305_s8 + $0x8] sm:$0xff] }
  0x2a   : > { %691 = vmatpush.bf16.msra.mxu1 %v2437_v25  ;;  %v2477_v4 = vld [vmem:[%s3305_s8 + $0x98] sm:$0xff]  ;;  %v2476_v8 = vld [vmem:[%s3305_s8 + $0x90] sm:$0xff]  ;;  %v2467_v11 = vld [vmem:[%s3305_s8 + $0x48] sm:$0xff] }
  0x2b   : > { %752 = vmatpush.bf16.msra.mxu2 %v2445_v27  ;;  %v2485_v5 = vld [vmem:[%s3305_s8 + $0xd8] sm:$0xff]  ;;  %v2484_v9 = vld [vmem:[%s3305_s8 + $0xd0] sm:$0xff]  ;;  %v2475_v12 = vld [vmem:[%s3305_s8 + $0x88] sm:$0xff] }
  0x2c   : > { %813 = vmatpush.bf16.msra.mxu3 %v2453_v28  ;;  %v2483_v13 = vld [vmem:[%s3305_s8 + $0xc8] sm:$0xff]  ;;  %v2458_v14 = vld [vmem:[%s3305_s8] sm:$0xff] }
  0x2d   : > { %631 = vmatpush.bf16.msra.mxu0 %v2428_v31  ;;  %v2466_v15 = vld [vmem:[%s3305_s8 + $0x40] sm:$0xff] }
  0x2e   : > { %692 = vmatpush.bf16.msra.mxu1 %v2436_v32  ;;  %v2474_v16 = vld [vmem:[%s3305_s8 + $0x80] sm:$0xff] }
  0x2f   : > { %753 = vmatpush.bf16.msra.mxu2 %v2444_v33  ;;  %v2482_v17 = vld [vmem:[%s3305_s8 + $0xc0] sm:$0xff] }
  0x30   : > { %814 = vmatpush.bf16.msra.mxu3 %v2452_v34  ;;  %v3045_v31 = vld [vmem:[%s3299_s2] ss:$0 sm:$0xff] }
  0x31   : > { %632 = vmatpush.bf16.msra.mxu0 %v2427_v37 }
  0x32   : > { %693 = vmatpush.bf16.msra.mxu1 %v2435_v38 }
  0x33   : > { %754 = vmatpush.bf16.msra.mxu2 %v2443_v39 }
  0x34   : > { %815 = vmatpush.bf16.msra.mxu3 %v2451_v40  ;;  %v2497_v40 = vld [vmem:[%s3301_s4 + $0x38] sm:$0xff] }
  0x35   : > { %633 = vmatpush.bf16.msra.mxu0 %v2426_v45  ;;  %v2496_v45 = vld [vmem:[%s3301_s4 + $0x30] sm:$0xff] }
  0x36   : > { %694 = vmatpush.bf16.msra.mxu1 %v2434_v46  ;;  %v2504_v46 = vld [vmem:[%s3301_s4 + $0x70] sm:$0xff] }
  0x37   : > { %755 = vmatpush.bf16.msra.mxu2 %v2442_v47  ;;  %v2512_v47 = vld [vmem:[%s3301_s4 + $0xb0] sm:$0xff] }
  0x38   : > { %816 = vmatpush.bf16.msra.mxu3 %v2450_v48  ;;  %v2520_v48 = vld [vmem:[%s3301_s4 + $0xf0] sm:$0xff] }
  0x39   : > { %950 = vmatpush.bf16.msrb.mxu0 %v2465_v49 }
  0x3a   : > { %1011 = vmatpush.bf16.msrb.mxu1 %v2473_v50  ;;  %v2495_v50 = vld [vmem:[%s3301_s4 + $0x28] sm:$0xff] }
  0x3b   : > { %1072 = vmatpush.bf16.msrb.mxu2 %v2481_v51  ;;  %v2503_v51 = vld [vmem:[%s3301_s4 + $0x68] sm:$0xff] }
  0x3c   : > { %1133 = vmatpush.bf16.msrb.mxu3 %v2489_v52  ;;  %v2511_v52 = vld [vmem:[%s3301_s4 + $0xa8] sm:$0xff] }
  0x3d   : > { %951 = vmatpush.bf16.msrb.mxu0 %v2464_v53  ;;  %v2519_v53 = vld [vmem:[%s3301_s4 + $0xe8] sm:$0xff] }
  0x3e   : > { %1012 = vmatpush.bf16.msrb.mxu1 %v2472_v54 }
  0x3f   : > { %1073 = vmatpush.bf16.msrb.mxu2 %v2480_v55  ;;  %v2494_v55 = vld [vmem:[%s3301_s4 + $0x20] sm:$0xff] }
  0x40   : > { %1134 = vmatpush.bf16.msrb.mxu3 %v2488_v56  ;;  %v2502_v56 = vld [vmem:[%s3301_s4 + $0x60] sm:$0xff] }
  0x41   : > { %952 = vmatpush.bf16.msrb.mxu0 %v2463_v57  ;;  %v2510_v57 = vld [vmem:[%s3301_s4 + $0xa0] sm:$0xff] }
  0x42   : > { %1013 = vmatpush.bf16.msrb.mxu1 %v2471_v58  ;;  %v2518_v58 = vld [vmem:[%s3301_s4 + $0xe0] sm:$0xff] }
  0x43   : > { %1074 = vmatpush.bf16.msrb.mxu2 %v2479_v59 }
  0x44   : > { %1135 = vmatpush.bf16.msrb.mxu3 %v2487_v60 }
  0x45   : > { %953 = vmatpush.bf16.msrb.mxu0 %v2462_v61  ;;  %v2493_v61 = vld [vmem:[%s3301_s4 + $0x18] sm:$0xff] }
  0x46   : > { %1014 = vmatpush.bf16.msrb.mxu1 %v2470_v62  ;;  %v2501_v62 = vld [vmem:[%s3301_s4 + $0x58] sm:$0xff] }
  0x47   : > { %1075 = vmatpush.bf16.msrb.mxu2 %v2478_v63  ;;  %v2509_v63 = vld [vmem:[%s3301_s4 + $0x98] sm:$0xff] }
  0x49   : > { %954 = vmatpush.bf16.msrb.mxu0 %v2461_v2 }
  0x4a   : > { %1015 = vmatpush.bf16.msrb.mxu1 %v2469_v3  ;;  %v2492_v3 = vld [vmem:[%s3301_s4 + $0x10] sm:$0xff] }
  0x4b   : > { %1076 = vmatpush.bf16.msrb.mxu2 %v2477_v4  ;;  %v2500_v4 = vld [vmem:[%s3301_s4 + $0x50] sm:$0xff] }
  0x4d   : > { %955 = vmatpush.bf16.msrb.mxu0 %v2460_v6  ;;  %v2508_v6 = vld [vmem:[%s3301_s4 + $0x90] sm:$0xff] }
  0x4e   : > { %1016 = vmatpush.bf16.msrb.mxu1 %v2468_v7  ;;  %v2516_v7 = vld [vmem:[%s3301_s4 + $0xd0] sm:$0xff] }
  0x4f   : > { %1077 = vmatpush.bf16.msrb.mxu2 %v2476_v8  ;;  %v2491_v8 = vld [vmem:[%s3301_s4 + $0x8] sm:$0xff] }
  0x51   : > { %956 = vmatpush.bf16.msrb.mxu0 %v2459_v10  ;;  %v2515_v10 = vld [vmem:[%s3301_s4 + $0xc8] sm:$0xff] }
  0x52   : > { %1017 = vmatpush.bf16.msrb.mxu1 %v2467_v11 }
  0x53   : > { %1078 = vmatpush.bf16.msrb.mxu2 %v2475_v12  ;;  %v2490_v12 = vld [vmem:[%s3301_s4] sm:$0xff] }
  0x55   : > { %957 = vmatpush.bf16.msrb.mxu0 %v2458_v14  ;;  %v2506_v14 = vld [vmem:[%s3301_s4 + $0x80] sm:$0xff] }
  0x56   : > { %1018 = vmatpush.bf16.msrb.mxu1 %v2466_v15  ;;  %v2514_v15 = vld [vmem:[%s3301_s4 + $0xc0] sm:$0xff] }
  0x57   : > { %1079 = vmatpush.bf16.msrb.mxu2 %v2474_v16 }
  0x90   : > { %v463_v29 = vpop.xlane.xlu0 %462 }
  0x91   : > { %v471_v30 = vmul.f32 %v2889_v26, %v463_v29 }
  0x93   : > { %v2910_v35 = vsub.f32 %v461_v0, %v471_v30  ;;  %v2486_v0 = vld [vmem:[%s3305_s8 + $0xe0] sm:$0xff] }
  0x94   : > { %1136 = vmatpush.bf16.msrb.mxu3 %v2486_v0  ;;  %v2517_v0 = vld [vmem:[%s3301_s4 + $0xd8] sm:$0xff] }
  0x95   : > { %v473_v36 = vmul.f32 %v2910_v35, %v2910_v35 }
  0x97   : > { %474 = vadd.xlane.f32.xlu1 %v473_v36 }
  0x98   : > { %v1165_v41 = vpop.xlane.xlu0 %1164  ;;  %1137 = vmatpush.bf16.msrb.mxu3 %v2485_v5 }
  0x99   : > { %v1173_v42 = vmul.f32 %v1165_v41, %v2889_v26  ;;  %v2505_v41 = vld [vmem:[%s3301_s4 + $0x78] sm:$0xff] }
  0x9b   : > { %v2928_v43 = vsub.f32 %v2832_v1, %v1173_v42  ;;  %v2513_v42 = vld [vmem:[%s3301_s4 + $0xb8] sm:$0xff] }
  0x9c   : > { %1138 = vmatpush.bf16.msrb.mxu3 %v2484_v9  ;;  %v2507_v9 = vld [vmem:[%s3301_s4 + $0x88] sm:$0xff] }
  0x9d   : > { %v1175_v44 = vmul.f32 %v2928_v43, %v2928_v43 }
  0x9f   : > { %1176 = vadd.xlane.f32.xlu1 %v1175_v44 }
  0xa0   : > { %1139 = vmatpush.bf16.msrb.mxu3 %v2483_v13  ;;  %v2498_v13 = vld [vmem:[%s3301_s4 + $0x40] sm:$0xff] }
  0xa4   : > { %1140 = vmatpush.bf16.msrb.mxu3 %v2482_v17 }
 0x10a   : > { %v475_v18 = vpop.xlane.xlu1 %474 }
 0x10b   : > { %v476_v19 = vmul.f32 %v475_v18, %v2889_v26  ;;  %v2588_v18 = vld [vmem:[%s3304_s7] ss:$0 sm:$0xff] }
 0x10d   : > { %v477_v20 = vadd.f32 1e-05, %v476_v19  ;;  %v2589_v19 = vld [vmem:[%s3304_s7 + $0x1] ss:$0 sm:$0xff] }
 0x10f   : > { %2603 = vrsqrt.f32 %v477_v20  ;;  %vm484_vm2 = vweird.f32 %v477_v20 }
 0x112   : > { %v1177_v21 = vpop.xlane.xlu1 %1176 }
 0x113   : > { %v1178_v22 = vmul.f32 %v1177_v21, %v2889_v26  ;;  %v3050_v26 = vld [vmem:[%s3300_s3] ss:$0 sm:$0xff] }
 0x115   : > { %v2604_v23 = vpop.eup %2603  ;;  %v1179_v27 = vadd.f32 1e-05, %v1178_v22 }
 0x116   : > { %v479_v24 = vmul.f32 %v2604_v23, %v477_v20  ;;  %vm485_vm1 = vweird.f32 %v2604_v23 }
 0x117   : > { %2605 = vrsqrt.f32 %v1179_v27  ;;  %vm486_vm3 = vmor %vm484_vm2, %vm485_vm1  ;;  %vm1186_vm4 = vweird.f32 %v1179_v27 }
 0x118   : > { %v480_v25 = vmul.f32 %v2604_v23, %v479_v24 }
 0x11a   : > { %v481_v28 = vmul.f32 0.5, %v480_v25 }
 0x11c   : > { %v482_v29 = vsub.f32 1.5, %v481_v28  ;;  %v2591_v28 = vld [vmem:[%s3304_s7 + $0x3] ss:$0 sm:$0xff] }
 0x11d   : > { %v2606_v34 = vpop.eup %2605 }
 0x11e   : > { %v483_v30 = vmul.f32 %v2604_v23, %v482_v29  ;;  %v1181_v38 = vmul.f32 %v2606_v34, %v1179_v27  ;;  %vm1187_vm5 = vweird.f32 %v2606_v34  ;;  %v2590_v27 = vld [vmem:[%s3304_s7 + $0x2] ss:$0 sm:$0xff] }
 0x11f   : > { %vm3103_vm6 = vmor %vm1186_vm4, %vm1187_vm5 }
 0x120   : > { %v487_v32 = vsel %vm486_vm3, %v2604_v23, %v483_v30  ;;  %v1182_v44 = vmul.f32 %v2606_v34, %v1181_v38 }
 0x121   : > { %v488_v33 = vmul.f32 %v487_v32, %v2910_v35  ;;  %v2521_v35 = vld [vmem:[%s3301_s4 + $0xf8] sm:$0xff] }
 0x122   : > { %v1183_v49 = vmul.f32 0.5, %v1182_v44 }
 0x123   : > { %v492_v36 = vmul.f32 %v3045_v31, %v488_v33 }
 0x124   : > { %v1184_v54 = vsub.f32 1.5, %v1183_v49 }
 0x125   : > { %v496_v37 = vadd.f32 %v3050_v26, %v492_v36 }
 0x126   : > { %v1185_v59 = vmul.f32 %v2606_v34, %v1184_v54 }
 0x127   : > { %v497_v39 = vpack.c.bf16 %v496_v37, %v496_v37  ;;  %v2592_v37 = vld [vmem:[%s3306_s9] ss:$0 sm:$0xff] }
 0x128   : > { %v1189_v2 = vsel %vm3103_vm6, %v2606_v34, %v1185_v59 }
 0x129   : > { %634 = vmatmul.bf16.vlgmr.msra.gmra.mxu0 %v497_v39  ;;  %695 = vmatmul.bf16.vlgmr.msra.gmra.mxu1 %v497_v39  ;;  %v1190_v5 = vmul.f32 %v1189_v2, %v2928_v43  ;;  %v2499_v43 = vld [vmem:[%s3301_s4 + $0x48] sm:$0xff] }
 0x12a   : > { %756 = vmatmul.bf16.vlgmr.msra.gmra.mxu2 %v497_v39  ;;  %817 = vmatmul.bf16.vlgmr.msra.gmra.mxu3 %v497_v39 }
 0x12b   : > { %1328 = vmatpush.bf16.msra.mxu0 %v2497_v40  ;;  %1389 = vmatpush.bf16.msra.mxu1 %v2505_v41  ;;  %v1194_v11 = vmul.f32 %v3045_v31, %v1190_v5 }
 0x12c   : > { %1450 = vmatpush.bf16.msra.mxu2 %v2513_v42  ;;  %1511 = vmatpush.bf16.msra.mxu3 %v2521_v35 }
 0x12d   : > { %v1198_v16 = vadd.f32 %v3050_v26, %v1194_v11 }
 0x12f   : > { %1329 = vmatpush.bf16.msra.mxu0 %v2496_v45  ;;  %1390 = vmatpush.bf16.msra.mxu1 %v2504_v46  ;;  %v1199_v17 = vpack.c.bf16 %v1198_v16, %v1198_v16 }
 0x130   : > { %1451 = vmatpush.bf16.msra.mxu2 %v2512_v47  ;;  %1512 = vmatpush.bf16.msra.mxu3 %v2520_v48 }
 0x133   : > { %1330 = vmatpush.bf16.msra.mxu0 %v2495_v50  ;;  %1391 = vmatpush.bf16.msra.mxu1 %v2503_v51 }
 0x134   : > { %1452 = vmatpush.bf16.msra.mxu2 %v2511_v52  ;;  %1513 = vmatpush.bf16.msra.mxu3 %v2519_v53  ;;  %v2594_v52 = vld [vmem:[%s3306_s9 + $0x2] ss:$0 sm:$0xff] }
 0x137   : > { %1331 = vmatpush.bf16.msra.mxu0 %v2494_v55  ;;  %1392 = vmatpush.bf16.msra.mxu1 %v2502_v56  ;;  %v2595_v55 = vld [vmem:[%s3306_s9 + $0x3] ss:$0 sm:$0xff] }
 0x138   : > { %1453 = vmatpush.bf16.msra.mxu2 %v2510_v57  ;;  %1514 = vmatpush.bf16.msra.mxu3 %v2518_v58 }
 0x139   : > { %958 = vmatmul.bf16.vlgmr.msrb.gmra.mxu0 %v497_v39  ;;  %1019 = vmatmul.bf16.vlgmr.msrb.gmra.mxu1 %v497_v39 }
 0x13a   : > { %1080 = vmatmul.bf16.vlgmr.msrb.gmra.mxu2 %v497_v39  ;;  %1141 = vmatmul.bf16.vlgmr.msrb.gmra.mxu3 %v497_v39  ;;  %v2593_v39 = vld [vmem:[%s3306_s9 + $0x1] ss:$0 sm:$0xff] }
 0x13b   : > { %1332 = vmatpush.bf16.msra.mxu0 %v2493_v61  ;;  %1393 = vmatpush.bf16.msra.mxu1 %v2501_v62 }
 0x13c   : > { %1454 = vmatpush.bf16.msra.mxu2 %v2509_v63  ;;  %1515 = vmatpush.bf16.msra.mxu3 %v2517_v0 }
 0x13f   : > { %1333 = vmatpush.bf16.msra.mxu0 %v2492_v3  ;;  %1394 = vmatpush.bf16.msra.mxu1 %v2500_v4 }
 0x140   : > { %1455 = vmatpush.bf16.msra.mxu2 %v2508_v6  ;;  %1516 = vmatpush.bf16.msra.mxu3 %v2516_v7  ;;  %v2596_v6 = vld [vmem:[%s3302_s5] ss:$0 sm:$0xff]  ;;  %v2597_v7 = vld [vmem:[%s3302_s5 + $0x1] ss:$0 sm:$0xff] }
 0x143   : > { %1334 = vmatpush.bf16.msra.mxu0 %v2491_v8  ;;  %1395 = vmatpush.bf16.msra.mxu1 %v2499_v43 }
 0x144   : > { %1456 = vmatpush.bf16.msra.mxu2 %v2507_v9  ;;  %1517 = vmatpush.bf16.msra.mxu3 %v2515_v10 }
 0x147   : > { %1335 = vmatpush.bf16.msra.mxu0 %v2490_v12  ;;  %1396 = vmatpush.bf16.msra.mxu1 %v2498_v13 }
 0x148   : > { %1457 = vmatpush.bf16.msra.mxu2 %v2506_v14  ;;  %1518 = vmatpush.bf16.msra.mxu3 %v2514_v15 }
 0x14a   : > { %1336 = vmatmul.bf16.vlgmr.msra.gmra.mxu0 %v1199_v17  ;;  %1397 = vmatmul.bf16.vlgmr.msra.gmra.mxu1 %v1199_v17 }
 0x14b   : > { %1458 = vmatmul.bf16.vlgmr.msra.gmra.mxu2 %v1199_v17  ;;  %1519 = vmatmul.bf16.vlgmr.msra.gmra.mxu3 %v1199_v17 }
 0x1a6   : > { %v635_v20 = vpop.f32.mrf.mxu0  ;;  %v696_v21 = vpop.f32.mrf.mxu1 }
 0x1a7   : > { %v636_v22 = vadd.f32 %v2588_v18, %v635_v20  ;;  %v697_v23 = vadd.f32 %v2589_v19, %v696_v21  ;;  %v2598_v19 = vld [vmem:[%s3302_s5 + $0x2] ss:$0 sm:$0xff]  ;;  %v2599_v20 = vld [vmem:[%s3302_s5 + $0x3] ss:$0 sm:$0xff] }
 0x1a9   : > { %v1146_v24 = vpack.c.bf16 %v636_v22, %v636_v22  ;;  %v1147_v25 = vpack.c.bf16 %v697_v23, %v697_v23 }
 0x1ab   : > { %1151 = vst.msk [vmem:[#allocation2] sm:$0xf] %vm1150_vm7, %v1146_v24 }
 0x1ac   : > { %1152 = vst.msk [vmem:[#allocation2 + $0x4] sm:$0xf] %vm1150_vm7, %v1147_v25 }
 0x1ad   : > { %v757_v29 = vpop.f32.mrf.mxu2  ;;  %v818_v30 = vpop.f32.mrf.mxu3 }
 0x1ae   : > { %v758_v31 = vadd.f32 %v2590_v27, %v757_v29  ;;  %v819_v32 = vadd.f32 %v2591_v28, %v818_v30  ;;  %v637_v26 = vpop.f32.mrf.mxu0  ;;  %v698_v33 = vpop.f32.mrf.mxu1 }
 0x1b0   : > { %v1148_v34 = vpack.c.bf16 %v758_v31, %v758_v31  ;;  %v1149_v36 = vpack.c.bf16 %v819_v32, %v819_v32 }
 0x1b2   : > { %1153 = vst.msk [vmem:[#allocation2 + $0x8] sm:$0xf] %vm1150_vm7, %v1148_v34  ;;  %v1528_v38 = vld [vmem:[#allocation2] sm:$0xf] }
 0x1b3   : > { %1154 = vst.msk [vmem:[#allocation2 + $0xc] sm:$0xf] %vm1150_vm7, %v1149_v36  ;;  %v1537_v40 = vsel %vm1532_vm8, %v1528_v38, 0  ;;  %v1529_v41 = vld [vmem:[#allocation2 + $0x4] sm:$0xf] }
 0x1b4   : > { %1546 = vmatpush.bf16.xpose.msrb.mxu0 %v1537_v40  ;;  %v1556_v42 = vsel %vm1532_vm8, %v1529_v41, 0 }
 0x1b5   : > { %v759_v35 = vpop.f32.mrf.mxu2  ;;  %v820_v44 = vpop.f32.mrf.mxu3  ;;  %1565 = vmatpush.bf16.xpose.msrb.mxu1 %v1556_v42 }
 0x1b6   : > { %v959_v45 = vpop.f32.mrf.mxu0  ;;  %v1020_v46 = vpop.f32.mrf.mxu1 }
 0x1b7   : > { %v960_v47 = vadd.f32 %v2592_v37, %v959_v45  ;;  %v1021_v48 = vadd.f32 %v2593_v39, %v1020_v46 }
 0x1b9   : > { %v1155_v49 = vpack.c.bf16 %v960_v47, %v960_v47  ;;  %v1156_v50 = vpack.c.bf16 %v1021_v48, %v1021_v48  ;;  %v1530_v51 = vld [vmem:[#allocation2 + $0x8] sm:$0xf] }
 0x1ba   : > { %v1575_v53 = vsel %vm1532_vm8, %v1530_v51, 0  ;;  %v1531_v54 = vld [vmem:[#allocation2 + $0xc] sm:$0xf] }
 0x1bb   : > { %1159 = vst.msk [vmem:[#allocation3] sm:$0xf] %vm1150_vm7, %v1155_v49  ;;  %1584 = vmatpush.bf16.xpose.msrb.mxu2 %v1575_v53  ;;  %v1594_v56 = vsel %vm1532_vm8, %v1531_v54, 0 }
 0x1bc   : > { %1160 = vst.msk [vmem:[#allocation3 + $0x4] sm:$0xf] %vm1150_vm7, %v1156_v50  ;;  %1603 = vmatpush.bf16.xpose.msrb.mxu3 %v1594_v56 }
 0x1bd   : > { %v1081_v57 = vpop.f32.mrf.mxu2  ;;  %v1142_v58 = vpop.f32.mrf.mxu3 }
 0x1be   : > { %v1082_v59 = vadd.f32 %v2594_v52, %v1081_v57  ;;  %v1143_v60 = vadd.f32 %v2595_v55, %v1142_v58  ;;  %v961_v61 = vpop.f32.mrf.mxu0  ;;  %v1022_v62 = vpop.f32.mrf.mxu1 }
 0x1c0   : > { %v1157_v63 = vpack.c.bf16 %v1082_v59, %v1082_v59  ;;  %v1158_v0 = vpack.c.bf16 %v1143_v60, %v1143_v60 }
 0x1c2   : > { %1161 = vst.msk [vmem:[#allocation3 + $0x8] sm:$0xf] %vm1150_vm7, %v1157_v63  ;;  %v1658_v2 = vld [vmem:[#allocation3] sm:$0xf] }
 0x1c3   : > { %1162 = vst.msk [vmem:[#allocation3 + $0xc] sm:$0xf] %vm1150_vm7, %v1158_v0  ;;  %v1667_v3 = vsel %vm1665_vm9, %v1658_v2, 0  ;;  %v1659_v4 = vld [vmem:[#allocation3 + $0x4] sm:$0xf]  ;;  %v2523_v2 = vld [vmem:[%s3307_s10 + $0x8] sm:$0xff] }
 0x1c4   : > { %1676 = vmatpush.bf16.msra.mxu0 %v1667_v3  ;;  %v1686_v5 = vsel %vm1665_vm9, %v1659_v4, 0 }
 0x1c5   : > { %v1083_v8 = vpop.f32.mrf.mxu2  ;;  %v1144_v43 = vpop.f32.mrf.mxu3  ;;  %1695 = vmatpush.bf16.msra.mxu1 %v1686_v5 }
 0x1c7   : > { %v1337_v9 = vpop.f32.mrf.mxu0  ;;  %v1398_v10 = vpop.f32.mrf.mxu1 }
 0x1c8   : > { %v1338_v11 = vadd.f32 %v2596_v6, %v1337_v9  ;;  %v1399_v12 = vadd.f32 %v2597_v7, %v1398_v10 }
 0x1c9   : > { %v1660_v13 = vld [vmem:[#allocation3 + $0x8] sm:$0xf] }
 0x1ca   : > { %v1524_v14 = vpack.c.bf16 %v1338_v11, %v1338_v11  ;;  %v1525_v15 = vpack.c.bf16 %v1399_v12, %v1399_v12  ;;  %v1705_v16 = vsel %vm1665_vm9, %v1660_v13, 0  ;;  %v1661_v17 = vld [vmem:[#allocation3 + $0xc] sm:$0xf] }
 0x1cb   : > { %1714 = vmatpush.bf16.msra.mxu2 %v1705_v16  ;;  %v1724_v18 = vsel %vm1665_vm9, %v1661_v17, 0  ;;  %v2522_v17 = vld [vmem:[%s3307_s10] sm:$0xff] }
 0x1cc   : > { %1733 = vmatpush.bf16.msra.mxu3 %v1724_v18  ;;  %2378 = vmatmul.msk.bf16.vlgmr.msrb.gmra.mxu0 %vm1532_vm8, %v1524_v14  ;;  %v2527_v18 = vld [vmem:[%s3307_s10 + $0x28] sm:$0xff] }
 0x1cd   : > { %2379 = vmatmul.msk.bf16.vlgmr.msrb.gmra.mxu1 %vm1532_vm8, %v1525_v15  ;;  %1780 = vmatpush.bf16.msrb.mxu0 %v2523_v2 }
 0x1ce   : > { %v1459_v21 = vpop.f32.mrf.mxu2  ;;  %v1520_v22 = vpop.f32.mrf.mxu3 }
 0x1cf   : > { %v1460_v23 = vadd.f32 %v2598_v19, %v1459_v21  ;;  %v1521_v24 = vadd.f32 %v2599_v20, %v1520_v22  ;;  %v1339_v25 = vpop.f32.mrf.mxu0  ;;  %v1400_v27 = vpop.f32.mrf.mxu1  ;;  %v2529_v19 = vld [vmem:[%s3307_s10 + $0x38] sm:$0xff]  ;;  %v2526_v21 = vld [vmem:[%s3307_s10 + $0x20] sm:$0xff]  ;;  %v2524_v22 = vld [vmem:[%s3307_s10 + $0x10] sm:$0xff] }
 0x1d0   : > { %v2525_v20 = vld [vmem:[%s3307_s10 + $0x18] sm:$0xff] }
 0x1d1   : > { %v1526_v28 = vpack.c.bf16 %v1460_v23, %v1460_v23  ;;  %v1527_v29 = vpack.c.bf16 %v1521_v24, %v1521_v24  ;;  %1781 = vmatpush.bf16.msrb.mxu0 %v2522_v17  ;;  %1808 = vmatpush.bf16.msrb.mxu1 %v2525_v20  ;;  %v2528_v23 = vld [vmem:[%s3307_s10 + $0x30] sm:$0xff] }
 0x1d3   : > { %2380 = vmatmul.msk.bf16.vlgmr.msrb.gmra.mxu2 %vm1532_vm8, %v1526_v28  ;;  %2381 = vmatmul.msk.bf16.vlgmr.msrb.gmra.mxu3 %vm1532_vm8, %v1527_v29 }
 0x1d4   : > { %1836 = vmatpush.bf16.msrb.mxu2 %v2527_v18  ;;  %1864 = vmatpush.bf16.msrb.mxu3 %v2529_v19 }
 0x1d5   : > { %1809 = vmatpush.bf16.msrb.mxu1 %v2524_v22 }
 0x1d6   : > { %v1461_v30 = vpop.f32.mrf.mxu2  ;;  %v1522_v31 = vpop.f32.mrf.mxu3 }
 0x1d8   : > { %1837 = vmatpush.bf16.msrb.mxu2 %v2526_v21  ;;  %1865 = vmatpush.bf16.msrb.mxu3 %v2528_v23 }
 0x249   : > { %v1548_v32 = vpop.f32.mrf.mxu0 }
 0x24a   : > { %v1567_v26 = vpop.f32.mrf.mxu1  ;;  %v1610_v33 = vsel %vm1609_vm10, %v1548_v32, -inf }
 0x24b   : > { %v1613_v34 = vsel %vm1609_vm10, %v1567_v26, -inf  ;;  %1611 = vmax.xlane.f32.xlu0 %v1610_v33 }
 0x24c   : > { %1614 = vmax.xlane.f32.xlu1 %v1613_v34 }
 0x251   : > { %v1550_v36 = vpop.f32.mrf.mxu0 }
 0x252   : > { %v1569_v37 = vpop.f32.mrf.mxu1 }
 0x256   : > { %v1586_v38 = vpop.f32.mrf.mxu2  ;;  %v1605_v39 = vpop.f32.mrf.mxu3 }
 0x257   : > { %v1616_v40 = vsel %vm1609_vm10, %v1586_v38, -inf  ;;  %v1619_v35 = vsel %vm1609_vm10, %v1605_v39, -inf }
 0x258   : > { %1617 = vmax.xlane.f32.xlu2 %v1616_v40 }
 0x25e   : > { %v1588_v41 = vpop.f32.mrf.mxu2  ;;  %v1607_v42 = vpop.f32.mrf.mxu3 }
 0x260   : > { %1620 = vmax.xlane.f32.xlu2 %v1619_v35 }
 0x2be   : > { %v1612_v44 = vpop.xlane.xlu0 %1611 }
 0x2bf   : > { %v1622_v45 = vsub.f32 %v1548_v32, %v1612_v44  ;;  %v1615_v49 = vpop.xlane.xlu1 %1614 }
 0x2c0   : > { %v1623_v52 = vsub.f32 %v1567_v26, %v1615_v49 }
 0x2c1   : > { %v1626_v46 = vmul.f32 1.442695, %v1622_v45  ;;  %v2600_v45 = vld [vmem:[%s3308_s11] ss:$0 sm:$0xff] }
 0x2c2   : > { %v1628_v54 = vmul.f32 1.442695, %v1623_v52 }
 0x2c3   : > { %2607 = vpow2.f32 %v1626_v46 }
 0x2c9   : > { %v2608_v47 = vpop.eup %2607 }
 0x2ca   : > { %v1634_v48 = vsel %vm1609_vm10, %v2608_v47, 0.0 }
 0x2cb   : > { %v1618_v50 = vpop.xlane.xlu2 %1617  ;;  %1635 = vadd.xlane.f32.xlu1 %v1634_v48 }
 0x2cc   : > { %v1624_v51 = vsub.f32 %v1586_v38, %v1618_v50 }
 0x2ce   : > { %v1630_v53 = vmul.f32 1.442695, %v1624_v51 }
 0x2d0   : > { %2609 = vpow2.f32 %v1630_v53 }
 0x2d1   : > { %2611 = vpow2.f32 %v1628_v54 }
 0x2d3   : > { %v1621_v55 = vpop.xlane.xlu2 %1620 }
 0x2d4   : > { %v1625_v56 = vsub.f32 %v1605_v39, %v1621_v55 }
 0x2d6   : > { %v2610_v57 = vpop.eup %2609  ;;  %v1632_v58 = vmul.f32 1.442695, %v1625_v56 }
 0x2d7   : > { %v1640_v59 = vsel %vm1609_vm10, %v2610_v57, 0.0  ;;  %v2612_v60 = vpop.eup %2611 }
 0x2d8   : > { %2613 = vpow2.f32 %v1632_v58  ;;  %1641 = vadd.xlane.f32.xlu2 %v1640_v59  ;;  %v1637_v62 = vsel %vm1609_vm10, %v2612_v60, 0.0 }
 0x2de   : > { %v2614_v61 = vpop.eup %2613 }
 0x2df   : > { %v1643_v63 = vsel %vm1609_vm10, %v2614_v61, 0.0 }
 0x2e0   : > { %1638 = vadd.xlane.f32.xlu2 %v1637_v62  ;;  %1644 = vadd.xlane.f32.xlu0 %v1643_v63 }
 0x33e   : > { %v1636_v0 = vpop.xlane.xlu1 %1635 }
 0x33f   : > { %2615 = vrcp.f32 %v1636_v0 }
 0x345   : > { %v2616_v3 = vpop.eup %2615 }
 0x346   : > { %v1650_v4 = vmul.f32 %v2616_v3, %v2608_v47 }
 0x348   : > { %v1654_v5 = vpack.c.bf16 %v1650_v4, %v1650_v4 }
 0x34a   : > { %2382 = vmatmul.msk.bf16.vlgmr.msra.gmra.mxu0 %vm1609_vm10, %v1654_v5 }
 0x34b   : > { %v1642_v6 = vpop.xlane.xlu2 %1641 }
 0x34c   : > { %2617 = vrcp.f32 %v1642_v6 }
 0x352   : > { %v2618_v7 = vpop.eup %2617 }
 0x353   : > { %v1652_v8 = vmul.f32 %v2618_v7, %v2610_v57  ;;  %v1639_v43 = vpop.xlane.xlu2 %1638  ;;  %v1645_v9 = vpop.xlane.xlu0 %1644 }
 0x354   : > { %2619 = vrcp.f32 %v1639_v43 }
 0x355   : > { %v1656_v10 = vpack.c.bf16 %v1652_v8, %v1652_v8  ;;  %2621 = vrcp.f32 %v1645_v9 }
 0x357   : > { %2384 = vmatmul.msk.bf16.vlgmr.msra.gmra.mxu2 %vm1609_vm10, %v1656_v10 }
 0x35a   : > { %v2620_v11 = vpop.eup %2619 }
 0x35b   : > { %v2622_v12 = vpop.eup %2621  ;;  %v1651_v13 = vmul.f32 %v2620_v11, %v2612_v60 }
 0x35c   : > { %v1653_v14 = vmul.f32 %v2622_v12, %v2614_v61 }
 0x35d   : > { %v1655_v15 = vpack.c.bf16 %v1651_v13, %v1651_v13 }
 0x35e   : > { %v1657_v16 = vpack.c.bf16 %v1653_v14, %v1653_v14 }
 0x35f   : > { %2383 = vmatmul.msk.bf16.vlgmr.msra.gmra.mxu1 %vm1609_vm10, %v1655_v15 }
 0x360   : > { %2385 = vmatmul.msk.bf16.vlgmr.msra.gmra.mxu3 %vm1609_vm10, %v1657_v16 }
 0x3c7   : > { %v1678_v24 = vpop.f32.mrf.mxu0 }
 0x3c8   : > { %v1739_v25 = vpack.c.bf16 %v1678_v24, %v1678_v24 }
 0x3ca   : > { %2394 = vmatmul.msk.bf16.vlgmr.msrb.gmra.mxu0 %vm1532_vm8, %v1739_v25 }
 0x3cf   : > { %v1680_v27 = vpop.f32.mrf.mxu0 }
 0x3da   : > { %v1716_v28 = vpop.f32.mrf.mxu2 }
 0x3db   : > { %v1741_v29 = vpack.c.bf16 %v1716_v28, %v1716_v28 }
 0x3dc   : > { %v1697_v30 = vpop.f32.mrf.mxu1 }
 0x3dd   : > { %v1740_v31 = vpack.c.bf16 %v1697_v30, %v1697_v30  ;;  %2412 = vmatmul.msk.bf16.vlgmr.msrb.gmra.mxu2 %vm1532_vm8, %v1741_v29 }
 0x3df   : > { %2403 = vmatmul.msk.bf16.vlgmr.msrb.gmra.mxu1 %vm1532_vm8, %v1740_v31 }
 0x3e2   : > { %v1718_v32 = vpop.f32.mrf.mxu2 }
 0x3e3   : > { %v1735_v26 = vpop.f32.mrf.mxu3 }
 0x3e4   : > { %v1742_v33 = vpack.c.bf16 %v1735_v26, %v1735_v26  ;;  %v1699_v34 = vpop.f32.mrf.mxu1 }
 0x3e6   : > { %2421 = vmatmul.msk.bf16.vlgmr.msrb.gmra.mxu3 %vm1532_vm8, %v1742_v33 }
 0x3eb   : > { %v1737_v36 = vpop.f32.mrf.mxu3 }
 0x447   : > { %v1783_v37 = vpop.f32.mrf.mxu0 }
 0x44f   : > { %v1785_v38 = vpop.f32.mrf.mxu0 }
 0x45c   : > { %v1811_v39 = vpop.f32.mrf.mxu1 }
 0x45d   : > { %v1871_v42 = vadd.f32 %v1811_v39, %v1783_v37 }
 0x460   : > { %v1839_v40 = vpop.f32.mrf.mxu2 }
 0x461   : > { %v1872_v35 = vadd.f32 %v1871_v42, %v1839_v40 }
 0x464   : > { %v1813_v41 = vpop.f32.mrf.mxu1 }
 0x468   : > { %v1841_v44 = vpop.f32.mrf.mxu2 }
 0x469   : > { %v1867_v46 = vpop.f32.mrf.mxu3 }
 0x46a   : > { %v1873_v47 = vadd.f32 %v1872_v35, %v1867_v46 }
 0x46c   : > { %v1878_v48 = vadd.f32 %v2600_v45, %v1873_v47 }
 0x46e   : > { %v1879_v49 = vadd.f32 %v1878_v48, %v2832_v1 }
 0x470   : > { %1880 = vst [vmem:[%s441_s19] sm:$0xff] %v1879_v49 }
 0x471   : > { %v1869_v50 = vpop.f32.mrf.mxu3 }
 0x472   : > { %2650 = shalt.err (!%p2647_p5)
}
 0x473   : > { %2530 = dma.vmem_to_hbm [thread:$0]  (%p2809_p4), %s1897_s1, 128, %s1899_s20, %s1882_s24  }
 0x474 PF: > { %p2536_p6 = scmp.ge.s32.totalorder %s2701_s26, 2  ;;  %s1910_s29 = sand.u32 1, %s2681_s21  }
 0x475   : > { %s1911_s25 = scalar_lea.sflag [#allocation5], %s1910_s29 }
 0x476   : > { %p2533_p7 = pnand %p2536_p6, %p2816_p8 }
 0x478   : > { %p2534_p9 = pneg %p2533_p7 }
 0x47a   : > { %2676 = dma.done.wait (%p2534_p9), %s1911_s25, 128  }
 0x47b   : > { %2678 = vsyncadd (%p2534_p9), %s1911_s25, 4294967168  ;;  %s25_s26 = sadd.s32 1, %s2701_s26   ;;  %s3322_s24 = sld [smem:[#allocation7_spill]] }
 0x47c   : > { %p22_p10 = scmp.ge.s32.totalorder %s25_s26, 4   ;;  %s3323_s25 = sld [smem:[#allocation8_spill]] }
 0x47d   : > { %s3324_s21 = smov %s2685_s22  ;;  %s3325_s22 = smov %s2689_s23 }
 0x47e   : > { %s3326_s23 = smov %s2822_s16  ;;  %24 = sbr.rel (!%p22_p10) target bundleno = 7 (0x7), region = 110 }
 0x483   :  { %1917 = vsyncpa [#allocation5], 1 }
 0x484   :  { %1919 = vsyncpa [#allocation5 + $0x1], 1 }

</bundles_post_ra>
